<compile_context>
chip_gen: v6e
topology: v6e:2x2x1
jax: 0.10.0
libtpu: 0.0.40
codegen_flags: <defaults>
</compile_context>

<pallas_src>
import functools

import jax
import jax.numpy as jnp
from jax import lax
from jax.experimental import pallas as pl
from jax.experimental.pallas import tpu as pltpu


# ----------------------------------------------------------------------------
# Kernel: out[b, o] = x[b, s_idx[o]]  (0 where s_idx[o] < 0), expressed as a
# one-hot matmul so the hot path is a single compare + MXU dot per tile.
# ----------------------------------------------------------------------------
def _rotate_kernel(sidx_ref, img_ref, lab_ref, img_out_ref, lab_out_ref,
                   *, HW, TILE_O):
    # sidx_ref: VMEM int32 (1, TILE_O) — source pixel index per output pixel,
    #           -1 marks "outside the source image" -> zero fill.
    s_idx = sidx_ref[...]                                        # (1, TILE_O)
    p_idx = lax.broadcasted_iota(jnp.int32, (HW, TILE_O), 0)     # source ids
    # Single broadcasted compare builds the one-hot selection slab; a column
    # that matches no row (s_idx == -1) is all-zero => zero fill.
    sel = (p_idx == s_idx).astype(jnp.float32)                   # (HW, TILE_O)

    img = img_ref[...].astype(jnp.float32)                       # (Mi, HW)
    lab = lab_ref[...].astype(jnp.float32)                       # (Ml, HW), exact for small ints

    img_out_ref[...] = jnp.dot(
        img, sel, preferred_element_type=jnp.float32
    ).astype(img_out_ref.dtype)
    lab_out_ref[...] = jnp.dot(
        lab, sel, preferred_element_type=jnp.float32
    ).astype(lab_out_ref.dtype)                                  # exact, no round needed


# ----------------------------------------------------------------------------
# Host-side (XLA) O(HW) precompute of the nearest-neighbour source index map.
# ----------------------------------------------------------------------------
def _source_index_map(H, W, cos_t, sin_t):
    cy = (H - 1) / 2.0
    cx = (W - 1) / 2.0
    oy = jnp.arange(H, dtype=jnp.float32)[:, None]               # (H, 1)
    ox = jnp.arange(W, dtype=jnp.float32)[None, :]               # (1, W)
    xo = ox - cx
    yo = oy - cy
    # Inverse affine map (torchvision: positive angle = counter-clockwise).
    sx = cos_t * xo - sin_t * yo + cx
    sy = sin_t * xo + cos_t * yo + cy
    # Nearest neighbour (round-half-even, like grid_sample nearest on CPU).
    sxr = jnp.round(sx)
    syr = jnp.round(sy)
    valid = (sxr >= 0) & (sxr <= W - 1) & (syr >= 0) & (syr <= H - 1)
    s_idx = jnp.where(
        valid, syr.astype(jnp.int32) * W + sxr.astype(jnp.int32), -1
    )
    return s_idx.reshape(1, H * W)


def _pick_tile_o(HW, max_sel_bytes=32 * 1024 * 1024):
    """Largest lane tile (multiple of 128) dividing HW whose f32 selection slab
    (HW x TILE_O) stays within a conservative VMEM budget (v7x has 64 MiB)."""
    candidates = [t for t in (2048, 1024, 512, 256, 128) if HW % t == 0]
    for t in candidates:
        if HW * t * 4 <= max_sel_bytes:
            return t
    return candidates[-1] if candidates else HW


# ----------------------------------------------------------------------------
# Fused image + label rotation (one pallas_call, selection built once).
# ----------------------------------------------------------------------------
def rotate_pair_nchw(image, label, cos_t, sin_t):
    N, Ci, H, W = image.shape
    Nl, Cl, Hl, Wl = label.shape
    assert (N, H, W) == (Nl, Hl, Wl), "image/label spatial+batch must match"
    HW = H * W
    Mi = N * Ci
    Ml = N * Cl

    s_idx = _source_index_map(H, W, cos_t, sin_t)                # (1, HW) int32
    img2 = image.reshape(Mi, HW)
    lab2 = label.reshape(Ml, HW)

    TILE_O = _pick_tile_o(HW)
    grid = (HW // TILE_O,)

    img_out, lab_out = pl.pallas_call(
        functools.partial(_rotate_kernel, HW=HW, TILE_O=TILE_O),
        out_shape=(
            jax.ShapeDtypeStruct((Mi, HW), image.dtype),
            jax.ShapeDtypeStruct((Ml, HW), label.dtype),
        ),
        grid_spec=pltpu.PrefetchScalarGridSpec(
            num_scalar_prefetch=0,
            grid=grid,
            in_specs=[
                pl.BlockSpec((1, TILE_O), lambda o: (0, o)),     # s_idx tile
                pl.BlockSpec((Mi, HW), lambda o: (0, 0)),        # image (resident)
                pl.BlockSpec((Ml, HW), lambda o: (0, 0)),        # label (resident)
            ],
            out_specs=[
                pl.BlockSpec((Mi, TILE_O), lambda o: (0, o)),
                pl.BlockSpec((Ml, TILE_O), lambda o: (0, o)),
            ],
        ),
        compiler_params=pltpu.CompilerParams(
            dimension_semantics=("parallel",),                   # dual-TC v7x
            vmem_limit_bytes=64 * 1024 * 1024,
        ),
    )(s_idx, img2, lab2)

    return img_out.reshape(N, Ci, H, W), lab_out.reshape(N, Cl, H, W)


class RandomRotationPallas:
    """Pallas equivalent of the PyTorch RandomRotation module."""

    def __init__(self, degrees):
        # torchvision accepts a single number (=> (-d, d)) or a (min, max) pair.
        if isinstance(degrees, (int, float)):
            degrees = (-float(degrees), float(degrees))
        self.degrees = (float(degrees[0]), float(degrees[1]))

    def __call__(self, sample, key):
        image, label = sample["image"], sample["label"]
        lo, hi = self.degrees
        # angle ~ U[lo, hi]  (RandomRotation.get_params)
        angle = jax.random.uniform(key, (), jnp.float32, lo, hi)
        theta = angle * (jnp.pi / 180.0)
        cos_t, sin_t = jnp.cos(theta), jnp.sin(theta)
        img_r, lab_r = rotate_pair_nchw(image, label, cos_t, sin_t)
        return {"image": img_r, "label": lab_r}


if __name__ == "__main__":
    key = jax.random.PRNGKey(0)
    k_img, k_lab, k_ang = jax.random.split(key, 3)

    # NCHW image and a single-channel segmentation-style label.
    image = jax.random.normal(k_img, (2, 4, 16, 16), dtype=jnp.float32)
    label = jax.random.randint(k_lab, (2, 1, 16, 16), 0, 4).astype(jnp.int32)

    module = RandomRotationPallas(degrees=(-30.0, 30.0))
    out = module({"image": image, "label": label}, k_ang)

    jax.block_until_ready(out["image"])
    jax.block_until_ready(out["label"])

    assert out["image"].shape == image.shape and out["image"].dtype == image.dtype
    assert out["label"].shape == label.shape and out["label"].dtype == label.dtype

    print("KERNEL_OK")
</pallas_src>

<mosaic_0001>
module attributes {stable_mosaic.version = 11 : i64} {
  func.func @_rotate_kernel(%arg0: i32, %arg1: memref<1x256xi32, #tpu.memory_space<vmem>>, %arg2: memref<8x256xf32, #tpu.memory_space<vmem>>, %arg3: memref<2x256xi32, #tpu.memory_space<vmem>>, %arg4: memref<8x256xf32, #tpu.memory_space<vmem>>, %arg5: memref<2x256xi32, #tpu.memory_space<vmem>>) attributes {dimension_semantics = [#tpu.dimension_semantics<parallel>], iteration_bounds = array<i64: 1>, scalar_prefetch = 0 : i64, scratch_operands = 0 : i64, tpu.core_type = #tpu.core_type<tc>, window_params = [{transform_indices = @transform_0, window_bounds = array<i64: 1, 256>}, {pipeline_mode = #tpu.pipeline_mode<synchronous>, transform_indices = @transform_1, window_bounds = array<i64: 8, 256>}, {pipeline_mode = #tpu.pipeline_mode<synchronous>, transform_indices = @transform_2, window_bounds = array<i64: 2, 256>}, {transform_indices = @transform_3, window_bounds = array<i64: 8, 256>}, {transform_indices = @transform_4, window_bounds = array<i64: 2, 256>}]} {
    %c0 = arith.constant 0 : index
    %c0_0 = arith.constant 0 : index
    %0 = vector.load %arg1[%c0, %c0_0] : memref<1x256xi32, #tpu.memory_space<vmem>>, vector<1x256xi32>
    %1 = tpu.iota {dimensions = array<i32: 0>} : vector<256x256xi32>
    %2 = vector.broadcast %0 : vector<1x256xi32> to vector<256x256xi32>
    %3 = arith.cmpi eq, %1, %2 : vector<256x256xi32>
    %4 = arith.extui %3 : vector<256x256xi1> to vector<256x256xi32>
    %5 = arith.sitofp %4 : vector<256x256xi32> to vector<256x256xf32>
    %c0_1 = arith.constant 0 : index
    %c0_2 = arith.constant 0 : index
    %6 = vector.load %arg2[%c0_1, %c0_2] : memref<8x256xf32, #tpu.memory_space<vmem>>, vector<8x256xf32>
    %c0_3 = arith.constant 0 : index
    %c0_4 = arith.constant 0 : index
    %7 = vector.load %arg3[%c0_3, %c0_4] : memref<2x256xi32, #tpu.memory_space<vmem>>, vector<2x256xi32>
    %8 = arith.sitofp %7 : vector<2x256xi32> to vector<2x256xf32>
    %cst = arith.constant dense<0.000000e+00> : vector<8x256xf32>
    %9 = tpu.matmul %6, %5, %cst {dimension_numbers = #tpu.dot_dimension_numbers<[1], [0], [0], [1], [0, 0, 1, 1], [], []>} : vector<8x256xf32>, vector<256x256xf32>, vector<8x256xf32> -> vector<8x256xf32>
    %c0_5 = arith.constant 0 : index
    %c0_6 = arith.constant 0 : index
    %10 = vector.load %arg4[%c0_5, %c0_6] : memref<8x256xf32, #tpu.memory_space<vmem>>, vector<8x256xf32>
    tpu.vector_store %arg4[%c0_5, %c0_6], %9 {strides = array<i32>} : memref<8x256xf32, #tpu.memory_space<vmem>>, vector<8x256xf32>,
    %cst_7 = arith.constant dense<0.000000e+00> : vector<2x256xf32>
    %11 = tpu.matmul %8, %5, %cst_7 {dimension_numbers = #tpu.dot_dimension_numbers<[1], [0], [0], [1], [0, 0, 1, 1], [], []>} : vector<2x256xf32>, vector<256x256xf32>, vector<2x256xf32> -> vector<2x256xf32>
    %12 = arith.fptosi %11 : vector<2x256xf32> to vector<2x256xi32>
    %c0_8 = arith.constant 0 : index
    %c0_9 = arith.constant 0 : index
    %13 = vector.load %arg5[%c0_8, %c0_9] : memref<2x256xi32, #tpu.memory_space<vmem>>, vector<2x256xi32>
    tpu.vector_store %arg5[%c0_8, %c0_9], %12 {strides = array<i32>} : memref<2x256xi32, #tpu.memory_space<vmem>>, vector<2x256xi32>,
    return
  }
  func.func @transform_0(%arg0: i32) -> (i32, i32) {
    %c0_i32 = arith.constant 0 : i32
    %c0_i32_0 = arith.constant 0 : i32
    return %c0_i32, %arg0 : i32, i32
  }
  func.func @transform_1(%arg0: i32) -> (i32, i32) {
    %c0_i32 = arith.constant 0 : i32
    %c0_i32_0 = arith.constant 0 : i32
    %c0_i32_1 = arith.constant 0 : i32
    return %c0_i32, %c0_i32_0 : i32, i32
  }
  func.func @transform_2(%arg0: i32) -> (i32, i32) {
    %c0_i32 = arith.constant 0 : i32
    %c0_i32_0 = arith.constant 0 : i32
    %c0_i32_1 = arith.constant 0 : i32
    return %c0_i32, %c0_i32_0 : i32, i32
  }
  func.func @transform_3(%arg0: i32) -> (i32, i32) {
    %c0_i32 = arith.constant 0 : i32
    %c0_i32_0 = arith.constant 0 : i32
    return %c0_i32, %arg0 : i32, i32
  }
  func.func @transform_4(%arg0: i32) -> (i32, i32) {
    %c0_i32 = arith.constant 0 : i32
    %c0_i32_0 = arith.constant 0 : i32
    return %c0_i32, %arg0 : i32, i32
  }
}

</mosaic_0001>

<bundles_post_ra>
// kernel: tpu_custom_call.1
= control target key start
LH: loop header
LB: loop body
LE: loop exit
PB: predicated region body
PF: predicated region fallthrough
CT: control target
= control target key end

     0   :  { %10 = vsyncpa [#allocation3], 0  ;;  %s1080_s0 = inlined_call_operand.hbm [shape: s32[1,256], index: 0, kind: input, shape index: {}]   ;;  %s1081_s1 = inlined_call_operand.hbm [shape: f32[8,256], index: 1, kind: input, shape index: {}]   ;;  %s1082_s2 = inlined_call_operand.hbm [shape: s32[2,256], index: 2, kind: input, shape index: {}]   ;;  %s1083_s3 = inlined_call_operand.hbm [shape: f32[8,256], index: 3, kind: output, shape index: {0}]   ;;  %s1084_s4 = inlined_call_operand.hbm [shape: s32[2,256], index: 4, kind: output, shape index: {1}]  }
   0x1   :  { %11 = vsyncpa [#allocation6], 0 }
   0x2   :  { %12 = vsyncpa [#allocation4], 0 }
   0x3   :  { %13 = vsyncpa [#allocation10], 0  ;;  %s799_s15 = smov [#allocation5]   ;;  %s800_s17 = smov [#allocation2]  }
   0x4   :  { %s30_s16 = sshll.u32 %s799_s15, 4  ;;  %s20_s18 = sshll.u32 %s800_s17, 4  ;;  %s31_s16 = int_to_ptr.vmem [resolvable:$true] %s30_s16  ;;  %s21_s18 = int_to_ptr.vmem [resolvable:$true] %s20_s18 }
   0x5   :  { %s699_s19 = scalar_lea.vmem %s31_s16, 256  ;;  %p704_p1 = scmp.lt.s32.totalorder %s31_s16, %s31_s16 }
   0x6   :  { %p700_p0 = scmp.ne.s32.totalorder %s31_s16, %s699_s19  ;;  %p705_p2 = scmp.lt.s32.totalorder %s699_s19, %s699_s19 }
   0x8   :  { %p706_p3 = por %p705_p2, %p704_p1 }
   0xa   :  { %p707_p4 = pnand %p706_p3, %p700_p0 }
   0xc   :  { %710 = shalt.err (!%p707_p4)
}
   0xd   :  { %33 = dma.hbm_to_vmem [thread:$0]  %s1081_s1, 256, %s31_s16, [#allocation6]  }
   0xe   :  { %s719_s22 = scalar_lea.vmem %s21_s18, 32  ;;  %p724_p6 = scmp.lt.s32.totalorder %s21_s18, %s21_s18 }
   0xf   :  { %p720_p5 = scmp.ne.s32.totalorder %s21_s18, %s719_s22  ;;  %p725_p7 = scmp.lt.s32.totalorder %s719_s22, %s719_s22 }
  0x11   :  { %p726_p8 = por %p725_p7, %p724_p6 }
  0x13   :  { %p727_p9 = pnand %p726_p8, %p720_p5 }
  0x15   :  { %730 = shalt.err (!%p727_p9)
}
  0x16   :  { %23 = dma.hbm_to_vmem [thread:$0]  %s1080_s0, 32, %s21_s18, [#allocation3]  }
  0x17   :  { %s801_s25 = smov [#allocation7]  }
  0x18   :  { %s40_s26 = sshll.u32 %s801_s25, 4  ;;  %s41_s26 = int_to_ptr.vmem [resolvable:$true] %s40_s26 }
  0x19   :  { %s739_s27 = scalar_lea.vmem %s41_s26, 64  ;;  %p744_p11 = scmp.lt.s32.totalorder %s41_s26, %s41_s26 }
  0x1a   :  { %p740_p10 = scmp.ne.s32.totalorder %s41_s26, %s739_s27  ;;  %p745_p12 = scmp.lt.s32.totalorder %s739_s27, %s739_s27 }
  0x1c   :  { %p746_p13 = por %p745_p12, %p744_p11 }
  0x1e   :  { %p747_p0 = pnand %p746_p13, %p740_p10 }
  0x20   :  { %750 = shalt.err (!%p747_p0)
}
  0x21   :  { %43 = dma.hbm_to_vmem [thread:$0]  %s1082_s2, 64, %s41_s26, [#allocation6]  }
  0x22   :  { %791 = dma.done.wait [#allocation3], 32  }
  0x23   :  { %792 = vsyncadd [#allocation3], 4294967264 }
  0x24   :  { %793 = dma.done.wait [#allocation6], 320  }
  0x25   :  { %794 = vsyncadd [#allocation6], 4294966976  ;;  %v54_v0 = vlaneseq  ;;  %v53_v6 = vld [vmem:[#allocation2] sm:$0x3]  ;;  %v288_v10 = vld [vmem:[#allocation5 + $0x8] sm:$0xff]  ;;  %v802_v12 = vmov 1.0  }
  0x26   :  { %355 = vmatprep.mubr.f32.mxu0 %v288_v10  ;;  %v803_v32 = vmov 1983009808   ;;  %v289_v38 = vld [vmem:[#allocation7] sm:$0xf]  ;;  %v287_v48 = vld [vmem:[#allocation5] sm:$0xff]  ;;  %s804_s0 = smov [#allocation8]  }
  0x27   :  { %v840_v1 = vshrl.u32 %v54_v0, 7  ;;  %v366_v33 = vunpack.c.l.s4 %v803_v32  ;;  %v290_v40 = vcvt.s32.f32 %v289_v38  ;;  %s463_s2 = sshll.u32 %s804_s0, 4  ;;  %s805_s29 = smov [#allocation9]   ;;  %s464_s2 = int_to_ptr.vmem [resolvable:$true] %s463_s2 }
  0x28   :  { %s473_s30 = sshll.u32 %s805_s29, 4  ;;  %s751_s5 = scalar_lea.vmem %s464_s2, 256  ;;  %s474_s30 = int_to_ptr.vmem [resolvable:$true] %s473_s30 }
  0x29   :  { %v89_v2 = vsub.s32 0, %v840_v1  ;;  %v93_v3 = vsub.s32 1, %v840_v1  ;;  %v70_v4 = vadd.s32 120, %v840_v1  ;;  %v69_v5 = vadd.s32 112, %v840_v1  ;;  %p752_p1 = scmp.ne.s32.totalorder %s464_s2, %s751_s5  ;;  %p756_p2 = scmp.lt.s32.totalorder %s464_s2, %s464_s2 }
  0x2a   :  { %v68_v9 = vadd.s32 104, %v840_v1  ;;  %v67_v11 = vadd.s32 96, %v840_v1  ;;  %v66_v13 = vadd.s32 88, %v840_v1  ;;  %v65_v14 = vadd.s32 80, %v840_v1  ;;  %p757_p3 = scmp.lt.s32.totalorder %s751_s5, %s751_s5 }
  0x2b   :  { %v846_v7 = vrot.slane %v53_v6, %v89_v2  ;;  %v848_v8 = vrot.slane %v53_v6, %v93_v3  ;;  %v64_v15 = vadd.s32 72, %v840_v1  ;;  %v63_v16 = vadd.s32 64, %v840_v1 }
  0x2c   :  { %v62_v17 = vadd.s32 56, %v840_v1  ;;  %v61_v18 = vadd.s32 48, %v840_v1  ;;  %v60_v19 = vadd.s32 40, %v840_v1  ;;  %v59_v20 = vadd.s32 32, %v840_v1  ;;  %p758_p4 = por %p757_p3, %p756_p2 }
  0x2d   :  { %vm126_vm0 = vcmp.eq.s32.totalorder %v70_v4, %v848_v8  ;;  %vm125_vm1 = vcmp.eq.s32.totalorder %v70_v4, %v846_v7  ;;  %vm124_vm2 = vcmp.eq.s32.totalorder %v69_v5, %v848_v8  ;;  %vm123_vm3 = vcmp.eq.s32.totalorder %v69_v5, %v846_v7 }
  0x2e   :  { %615 = vmatprep.subr.msk.mxu1 %vm126_vm0, %v802_v12  ;;  %551 = vmatprep.subr.msk.mxu0 %vm126_vm0, %v802_v12  ;;  %vm122_vm4 = vcmp.eq.s32.totalorder %v68_v9, %v848_v8  ;;  %vm121_vm5 = vcmp.eq.s32.totalorder %v68_v9, %v846_v7  ;;  %vm120_vm6 = vcmp.eq.s32.totalorder %v67_v11, %v848_v8  ;;  %v58_v21 = vadd.s32 24, %v840_v1  ;;  %p759_p5 = pnand %p758_p4, %p752_p1 }
  0x2f   :  { %616 = vmatpush1.msk.msra.mxu1 %vm125_vm1, %v802_v12  ;;  %552 = vmatpush1.msk.msra.mxu0 %vm125_vm1, %v802_v12  ;;  %vm119_vm7 = vcmp.eq.s32.totalorder %v67_v11, %v846_v7  ;;  %vm118_vm8 = vcmp.eq.s32.totalorder %v66_v13, %v848_v8  ;;  %vm117_vm9 = vcmp.eq.s32.totalorder %v66_v13, %v846_v7  ;;  %v57_v22 = vadd.s32 16, %v840_v1 }
  0x30   :  { %617 = vmatprep.subr.msk.mxu1 %vm124_vm2, %v802_v12  ;;  %553 = vmatprep.subr.msk.mxu0 %vm124_vm2, %v802_v12  ;;  %vm116_vm10 = vcmp.eq.s32.totalorder %v65_v14, %v848_v8  ;;  %vm115_vm11 = vcmp.eq.s32.totalorder %v65_v14, %v846_v7  ;;  %vm114_vm12 = vcmp.eq.s32.totalorder %v64_v15, %v848_v8  ;;  %v56_v23 = vadd.s32 8, %v840_v1 }
  0x31   :  { %618 = vmatpush1.msk.msra.mxu1 %vm123_vm3, %v802_v12  ;;  %554 = vmatpush1.msk.msra.mxu0 %vm123_vm3, %v802_v12  ;;  %vm113_vm13 = vcmp.eq.s32.totalorder %v64_v15, %v846_v7  ;;  %vm112_vm14 = vcmp.eq.s32.totalorder %v63_v16, %v848_v8  ;;  %vm111_vm15 = vcmp.eq.s32.totalorder %v63_v16, %v846_v7  ;;  %v86_v24 = vadd.s32 248, %v840_v1 }
  0x32   :  { %619 = vmatprep.subr.msk.mxu1 %vm122_vm4, %v802_v12  ;;  %555 = vmatprep.subr.msk.mxu0 %vm122_vm4, %v802_v12  ;;  %vm110_vm0 = vcmp.eq.s32.totalorder %v62_v17, %v848_v8  ;;  %vm109_vm1 = vcmp.eq.s32.totalorder %v62_v17, %v846_v7  ;;  %vm108_vm2 = vcmp.eq.s32.totalorder %v61_v18, %v848_v8  ;;  %v85_v25 = vadd.s32 240, %v840_v1 }
  0x33   :  { %620 = vmatpush1.msk.msra.mxu1 %vm121_vm5, %v802_v12  ;;  %556 = vmatpush1.msk.msra.mxu0 %vm121_vm5, %v802_v12  ;;  %vm107_vm3 = vcmp.eq.s32.totalorder %v61_v18, %v846_v7  ;;  %vm106_vm4 = vcmp.eq.s32.totalorder %v60_v19, %v848_v8  ;;  %vm105_vm5 = vcmp.eq.s32.totalorder %v60_v19, %v846_v7  ;;  %v84_v26 = vadd.s32 232, %v840_v1 }
  0x34   :  { %621 = vmatprep.subr.msk.mxu1 %vm120_vm6, %v802_v12  ;;  %557 = vmatprep.subr.msk.mxu0 %vm120_vm6, %v802_v12  ;;  %vm104_vm6 = vcmp.eq.s32.totalorder %v59_v20, %v848_v8  ;;  %v83_v27 = vadd.s32 224, %v840_v1  ;;  %v82_v28 = vadd.s32 216, %v840_v1  ;;  %v81_v29 = vadd.s32 208, %v840_v1 }
  0x35   :  { %622 = vmatpush1.msk.msra.mxu1 %vm119_vm7, %v802_v12  ;;  %558 = vmatpush1.msk.msra.mxu0 %vm119_vm7, %v802_v12  ;;  %vm103_vm7 = vcmp.eq.s32.totalorder %v59_v20, %v846_v7  ;;  %v80_v30 = vadd.s32 200, %v840_v1  ;;  %v79_v31 = vadd.s32 192, %v840_v1  ;;  %v78_v34 = vadd.s32 184, %v840_v1 }
  0x36   :  { %623 = vmatprep.subr.msk.mxu1 %vm118_vm8, %v802_v12  ;;  %559 = vmatprep.subr.msk.mxu0 %vm118_vm8, %v802_v12  ;;  %vm102_vm8 = vcmp.eq.s32.totalorder %v58_v21, %v848_v8  ;;  %v77_v35 = vadd.s32 176, %v840_v1  ;;  %v367_v36 = vunpack.c.0.s8 %v366_v33  ;;  %v76_v37 = vadd.s32 168, %v840_v1 }
  0x37   :  { %624 = vmatpush1.msk.msra.mxu1 %vm117_vm9, %v802_v12  ;;  %560 = vmatpush1.msk.msra.mxu0 %vm117_vm9, %v802_v12  ;;  %vm101_vm9 = vcmp.eq.s32.totalorder %v58_v21, %v846_v7  ;;  %v75_v39 = vadd.s32 160, %v840_v1  ;;  %v74_v42 = vadd.s32 152, %v840_v1  ;;  %v73_v43 = vadd.s32 144, %v840_v1 }
  0x38   :  { %625 = vmatprep.subr.msk.mxu1 %vm116_vm10, %v802_v12  ;;  %561 = vmatprep.subr.msk.mxu0 %vm116_vm10, %v802_v12  ;;  %vm100_vm10 = vcmp.eq.s32.totalorder %v57_v22, %v848_v8  ;;  %v370_v41 = vsub.s32 %v367_v36, %v840_v1  ;;  %v72_v45 = vadd.s32 136, %v840_v1  ;;  %v71_v46 = vadd.s32 128, %v840_v1 }
  0x39   :  { %626 = vmatpush1.msk.msra.mxu1 %vm115_vm11, %v802_v12  ;;  %562 = vmatpush1.msk.msra.mxu0 %vm115_vm11, %v802_v12  ;;  %vm99_vm11 = vcmp.eq.s32.totalorder %v57_v22, %v846_v7 }
  0x3a   :  { %627 = vmatprep.subr.msk.mxu1 %vm114_vm12, %v802_v12  ;;  %563 = vmatprep.subr.msk.mxu0 %vm114_vm12, %v802_v12  ;;  %vm98_vm12 = vcmp.eq.s32.totalorder %v56_v23, %v848_v8  ;;  %v371_v44 = vrot.slane %v290_v40, %v370_v41 }
  0x3b   :  { %628 = vmatpush1.msk.msra.mxu1 %vm113_vm13, %v802_v12  ;;  %564 = vmatpush1.msk.msra.mxu0 %vm113_vm13, %v802_v12  ;;  %vm97_vm13 = vcmp.eq.s32.totalorder %v56_v23, %v846_v7 }
  0x3c   :  { %629 = vmatprep.subr.msk.mxu1 %vm112_vm14, %v802_v12  ;;  %565 = vmatprep.subr.msk.mxu0 %vm112_vm14, %v802_v12  ;;  %vm96_vm14 = vcmp.eq.s32.totalorder %v840_v1, %v848_v8  ;;  %v372_v47 = vcombine.high %v371_v44, %v371_v44 }
  0x3d   :  { %630 = vmatpush1.msk.msra.mxu1 %vm111_vm15, %v802_v12  ;;  %566 = vmatpush1.msk.msra.mxu0 %vm111_vm15, %v802_v12  ;;  %vm95_vm15 = vcmp.eq.s32.totalorder %v840_v1, %v846_v7 }
  0x3e   :  { %631 = vmatprep.subr.msk.mxu1 %vm110_vm0, %v802_v12  ;;  %567 = vmatprep.subr.msk.mxu0 %vm110_vm0, %v802_v12  ;;  %vm158_vm0 = vcmp.eq.s32.totalorder %v86_v24, %v848_v8 }
  0x3f   :  { %632 = vmatpush1.msk.msra.mxu1 %vm109_vm1, %v802_v12  ;;  %568 = vmatpush1.msk.msra.mxu0 %vm109_vm1, %v802_v12  ;;  %vm157_vm1 = vcmp.eq.s32.totalorder %v86_v24, %v846_v7 }
  0x40   :  { %633 = vmatprep.subr.msk.mxu1 %vm108_vm2, %v802_v12  ;;  %569 = vmatprep.subr.msk.mxu0 %vm108_vm2, %v802_v12  ;;  %vm156_vm2 = vcmp.eq.s32.totalorder %v85_v25, %v848_v8 }
  0x41   :  { %634 = vmatpush1.msk.msra.mxu1 %vm107_vm3, %v802_v12  ;;  %570 = vmatpush1.msk.msra.mxu0 %vm107_vm3, %v802_v12  ;;  %vm155_vm3 = vcmp.eq.s32.totalorder %v85_v25, %v846_v7 }
  0x42   :  { %635 = vmatprep.subr.msk.mxu1 %vm106_vm4, %v802_v12  ;;  %571 = vmatprep.subr.msk.mxu0 %vm106_vm4, %v802_v12  ;;  %vm154_vm4 = vcmp.eq.s32.totalorder %v84_v26, %v848_v8 }
  0x43   :  { %636 = vmatpush1.msk.msra.mxu1 %vm105_vm5, %v802_v12  ;;  %572 = vmatpush1.msk.msra.mxu0 %vm105_vm5, %v802_v12  ;;  %vm153_vm5 = vcmp.eq.s32.totalorder %v84_v26, %v846_v7 }
  0x44   :  { %637 = vmatprep.subr.msk.mxu1 %vm104_vm6, %v802_v12  ;;  %573 = vmatprep.subr.msk.mxu0 %vm104_vm6, %v802_v12  ;;  %vm152_vm6 = vcmp.eq.s32.totalorder %v83_v27, %v848_v8 }
  0x45   :  { %638 = vmatpush1.msk.msra.mxu1 %vm103_vm7, %v802_v12  ;;  %574 = vmatpush1.msk.msra.mxu0 %vm103_vm7, %v802_v12  ;;  %vm151_vm7 = vcmp.eq.s32.totalorder %v83_v27, %v846_v7 }
  0x46   :  { %639 = vmatprep.subr.msk.mxu1 %vm102_vm8, %v802_v12  ;;  %575 = vmatprep.subr.msk.mxu0 %vm102_vm8, %v802_v12  ;;  %vm150_vm8 = vcmp.eq.s32.totalorder %v82_v28, %v848_v8 }
  0x47   :  { %640 = vmatpush1.msk.msra.mxu1 %vm101_vm9, %v802_v12  ;;  %576 = vmatpush1.msk.msra.mxu0 %vm101_vm9, %v802_v12  ;;  %vm149_vm9 = vcmp.eq.s32.totalorder %v82_v28, %v846_v7 }
  0x48   :  { %641 = vmatprep.subr.msk.mxu1 %vm100_vm10, %v802_v12  ;;  %577 = vmatprep.subr.msk.mxu0 %vm100_vm10, %v802_v12  ;;  %vm148_vm10 = vcmp.eq.s32.totalorder %v81_v29, %v848_v8 }
  0x49   :  { %642 = vmatpush1.msk.msra.mxu1 %vm99_vm11, %v802_v12  ;;  %578 = vmatpush1.msk.msra.mxu0 %vm99_vm11, %v802_v12  ;;  %vm147_vm11 = vcmp.eq.s32.totalorder %v81_v29, %v846_v7 }
  0x4a   :  { %643 = vmatprep.subr.msk.mxu1 %vm98_vm12, %v802_v12  ;;  %579 = vmatprep.subr.msk.mxu0 %vm98_vm12, %v802_v12  ;;  %vm146_vm12 = vcmp.eq.s32.totalorder %v80_v30, %v848_v8 }
  0x4b   :  { %644 = vmatpush1.msk.msra.mxu1 %vm97_vm13, %v802_v12  ;;  %580 = vmatpush1.msk.msra.mxu0 %vm97_vm13, %v802_v12  ;;  %vm145_vm13 = vcmp.eq.s32.totalorder %v80_v30, %v846_v7 }
  0x4c   :  { %645 = vmatprep.subr.msk.mxu1 %vm96_vm14, %v802_v12  ;;  %581 = vmatprep.subr.msk.mxu0 %vm96_vm14, %v802_v12  ;;  %vm144_vm14 = vcmp.eq.s32.totalorder %v79_v31, %v848_v8 }
  0x4d   :  { %646 = vmatpush1.msk.msra.mxu1 %vm95_vm15, %v802_v12  ;;  %582 = vmatpush1.msk.msra.mxu0 %vm95_vm15, %v802_v12  ;;  %vm143_vm15 = vcmp.eq.s32.totalorder %v79_v31, %v846_v7 }
  0x4e   :  { %647 = vmatprep.subr.msk.mxu1 %vm158_vm0, %v802_v12  ;;  %583 = vmatprep.subr.msk.mxu0 %vm158_vm0, %v802_v12  ;;  %vm142_vm0 = vcmp.eq.s32.totalorder %v78_v34, %v848_v8 }
  0x4f   :  { %648 = vmatpush2.msk.msra.mxu1 %vm157_vm1, %v802_v12  ;;  %584 = vmatpush2.msk.msra.mxu0 %vm157_vm1, %v802_v12  ;;  %vm141_vm1 = vcmp.eq.s32.totalorder %v78_v34, %v846_v7 }
  0x50   :  { %649 = vmatprep.subr.msk.mxu1 %vm156_vm2, %v802_v12  ;;  %585 = vmatprep.subr.msk.mxu0 %vm156_vm2, %v802_v12  ;;  %vm140_vm2 = vcmp.eq.s32.totalorder %v77_v35, %v848_v8 }
  0x51   :  { %650 = vmatpush2.msk.msra.mxu1 %vm155_vm3, %v802_v12  ;;  %586 = vmatpush2.msk.msra.mxu0 %vm155_vm3, %v802_v12  ;;  %vm139_vm3 = vcmp.eq.s32.totalorder %v77_v35, %v846_v7 }
  0x52   :  { %651 = vmatprep.subr.msk.mxu1 %vm154_vm4, %v802_v12  ;;  %587 = vmatprep.subr.msk.mxu0 %vm154_vm4, %v802_v12  ;;  %vm138_vm4 = vcmp.eq.s32.totalorder %v76_v37, %v848_v8 }
  0x53   :  { %652 = vmatpush2.msk.msra.mxu1 %vm153_vm5, %v802_v12  ;;  %588 = vmatpush2.msk.msra.mxu0 %vm153_vm5, %v802_v12  ;;  %vm137_vm5 = vcmp.eq.s32.totalorder %v76_v37, %v846_v7 }
  0x54   :  { %653 = vmatprep.subr.msk.mxu1 %vm152_vm6, %v802_v12  ;;  %589 = vmatprep.subr.msk.mxu0 %vm152_vm6, %v802_v12  ;;  %vm136_vm6 = vcmp.eq.s32.totalorder %v75_v39, %v848_v8 }
  0x55   :  { %654 = vmatpush2.msk.msra.mxu1 %vm151_vm7, %v802_v12  ;;  %590 = vmatpush2.msk.msra.mxu0 %vm151_vm7, %v802_v12  ;;  %vm135_vm7 = vcmp.eq.s32.totalorder %v75_v39, %v846_v7 }
  0x56   :  { %655 = vmatprep.subr.msk.mxu1 %vm150_vm8, %v802_v12  ;;  %591 = vmatprep.subr.msk.mxu0 %vm150_vm8, %v802_v12  ;;  %vm134_vm8 = vcmp.eq.s32.totalorder %v74_v42, %v848_v8 }
  0x57   :  { %656 = vmatpush2.msk.msra.mxu1 %vm149_vm9, %v802_v12  ;;  %592 = vmatpush2.msk.msra.mxu0 %vm149_vm9, %v802_v12  ;;  %vm133_vm9 = vcmp.eq.s32.totalorder %v74_v42, %v846_v7 }
  0x58   :  { %657 = vmatprep.subr.msk.mxu1 %vm148_vm10, %v802_v12  ;;  %593 = vmatprep.subr.msk.mxu0 %vm148_vm10, %v802_v12  ;;  %vm132_vm10 = vcmp.eq.s32.totalorder %v73_v43, %v848_v8 }
  0x59   :  { %658 = vmatpush2.msk.msra.mxu1 %vm147_vm11, %v802_v12  ;;  %594 = vmatpush2.msk.msra.mxu0 %vm147_vm11, %v802_v12  ;;  %vm131_vm11 = vcmp.eq.s32.totalorder %v73_v43, %v846_v7 }
  0x5a   :  { %659 = vmatprep.subr.msk.mxu1 %vm146_vm12, %v802_v12  ;;  %595 = vmatprep.subr.msk.mxu0 %vm146_vm12, %v802_v12  ;;  %vm130_vm12 = vcmp.eq.s32.totalorder %v72_v45, %v848_v8 }
  0x5b   :  { %660 = vmatpush2.msk.msra.mxu1 %vm145_vm13, %v802_v12  ;;  %596 = vmatpush2.msk.msra.mxu0 %vm145_vm13, %v802_v12  ;;  %vm129_vm13 = vcmp.eq.s32.totalorder %v72_v45, %v846_v7 }
  0x5c   :  { %661 = vmatprep.subr.msk.mxu1 %vm144_vm14, %v802_v12  ;;  %597 = vmatprep.subr.msk.mxu0 %vm144_vm14, %v802_v12  ;;  %vm128_vm14 = vcmp.eq.s32.totalorder %v71_v46, %v848_v8 }
  0x5d   :  { %662 = vmatpush2.msk.msra.mxu1 %vm143_vm15, %v802_v12  ;;  %598 = vmatpush2.msk.msra.mxu0 %vm143_vm15, %v802_v12  ;;  %vm127_vm15 = vcmp.eq.s32.totalorder %v71_v46, %v846_v7 }
  0x5e   :  { %663 = vmatprep.subr.msk.mxu1 %vm142_vm0, %v802_v12  ;;  %599 = vmatprep.subr.msk.mxu0 %vm142_vm0, %v802_v12 }
  0x5f   :  { %664 = vmatpush2.msk.msra.mxu1 %vm141_vm1, %v802_v12  ;;  %600 = vmatpush2.msk.msra.mxu0 %vm141_vm1, %v802_v12 }
  0x60   :  { %665 = vmatprep.subr.msk.mxu1 %vm140_vm2, %v802_v12  ;;  %601 = vmatprep.subr.msk.mxu0 %vm140_vm2, %v802_v12 }
  0x61   :  { %666 = vmatpush2.msk.msra.mxu1 %vm139_vm3, %v802_v12  ;;  %602 = vmatpush2.msk.msra.mxu0 %vm139_vm3, %v802_v12 }
  0x62   :  { %667 = vmatprep.subr.msk.mxu1 %vm138_vm4, %v802_v12  ;;  %603 = vmatprep.subr.msk.mxu0 %vm138_vm4, %v802_v12 }
  0x63   :  { %668 = vmatpush2.msk.msra.mxu1 %vm137_vm5, %v802_v12  ;;  %604 = vmatpush2.msk.msra.mxu0 %vm137_vm5, %v802_v12 }
  0x64   :  { %669 = vmatprep.subr.msk.mxu1 %vm136_vm6, %v802_v12  ;;  %605 = vmatprep.subr.msk.mxu0 %vm136_vm6, %v802_v12 }
  0x65   :  { %670 = vmatpush2.msk.msra.mxu1 %vm135_vm7, %v802_v12  ;;  %606 = vmatpush2.msk.msra.mxu0 %vm135_vm7, %v802_v12 }
  0x66   :  { %671 = vmatprep.subr.msk.mxu1 %vm134_vm8, %v802_v12  ;;  %607 = vmatprep.subr.msk.mxu0 %vm134_vm8, %v802_v12 }
  0x67   :  { %672 = vmatpush2.msk.msra.mxu1 %vm133_vm9, %v802_v12  ;;  %608 = vmatpush2.msk.msra.mxu0 %vm133_vm9, %v802_v12 }
  0x68   :  { %673 = vmatprep.subr.msk.mxu1 %vm132_vm10, %v802_v12  ;;  %609 = vmatprep.subr.msk.mxu0 %vm132_vm10, %v802_v12 }
  0x69   :  { %674 = vmatpush2.msk.msra.mxu1 %vm131_vm11, %v802_v12  ;;  %610 = vmatpush2.msk.msra.mxu0 %vm131_vm11, %v802_v12 }
  0x6a   :  { %675 = vmatprep.subr.msk.mxu1 %vm130_vm12, %v802_v12  ;;  %439 = vmatprep.mubr.f32.mxu1 %v372_v47 }
  0x6b   :  { %676 = vmatpush2.msk.msra.mxu1 %vm129_vm13, %v802_v12  ;;  %611 = vmatprep.subr.msk.mxu0 %vm130_vm12, %v802_v12 }
  0x6c   :  { %677 = vmatprep.subr.msk.mxu1 %vm128_vm14, %v802_v12  ;;  %612 = vmatpush2.msk.msra.mxu0 %vm129_vm13, %v802_v12 }
  0x6d   :  { %678 = vmatpush2.msk.msra.mxu1 %vm127_vm15, %v802_v12  ;;  %613 = vmatprep.subr.msk.mxu0 %vm128_vm14, %v802_v12 }
  0x6e   :  { %440 = vmatmul.mubr.f32.vlgmr.msra.gmra.mxu1 %v371_v44  ;;  %614 = vmatpush2.msk.msra.mxu0 %vm127_vm15, %v802_v12 }
  0x6f   :  { %356 = vmatmul.mubr.f32.vlgmr.msra.gmra.mxu0 %v287_v48 }
 0x12e   :  { %v441_v49 = vpop.f32.mrf.mxu1 }
 0x12f   :  { %v680_v50 = vtrunc.f32 %v441_v49  ;;  %v357_v51 = vpop.f32.mrf.mxu0 }
 0x130   :  { %v443_v52 = vpop.f32.mrf.mxu1  ;;  %362 = vst [vmem:[#allocation8] sm:$0xff] %v357_v51 }
 0x131   :  { %v682_v53 = vtrunc.f32 %v443_v52  ;;  %v359_v54 = vpop.f32.mrf.mxu0  ;;  %v681_v55 = vcvt.f32.s32 %v680_v50 }
 0x132   :  { %363 = vst [vmem:[#allocation8 + $0x8] sm:$0xff] %v359_v54 }
 0x133   :  { %v683_v56 = vcvt.f32.s32 %v682_v53 }
 0x134   :  { %762 = shalt.err (!%p759_p5)
}
 0x135   :  { %466 = dma.vmem_to_hbm [thread:$0]  %s464_s2, 256, %s1083_s3, [#allocation4]   ;;  %v448_v57 = vcombine.low %v681_v55, %v683_v56 }
 0x136   :  { %s771_s8 = scalar_lea.vmem %s474_s30, 64  ;;  %p776_p7 = scmp.lt.s32.totalorder %s474_s30, %s474_s30 }
 0x137   :  { %679 = vst.sshfl [vmem:[#allocation9] sm:$0x33 pattern:$0x76325410] %v448_v57  ;;  %p772_p6 = scmp.ne.s32.totalorder %s474_s30, %s771_s8  ;;  %p777_p8 = scmp.lt.s32.totalorder %s771_s8, %s771_s8 }
 0x139   :  { %p778_p9 = por %p777_p8, %p776_p7 }
 0x13b   :  { %p779_p10 = pnand %p778_p9, %p772_p6 }
 0x13d   :  { %782 = shalt.err (!%p779_p10)
}
 0x13e   :  { %476 = dma.vmem_to_hbm [thread:$0]  %s474_s30, 64, %s1084_s4, [#allocation10]  }
 0x13f   :  { %795 = dma.done.wait [#allocation4], 256  }
 0x140   :  { %796 = vsyncadd [#allocation4], 4294967040 }
 0x141   :  { %797 = dma.done.wait [#allocation10], 64  }
 0x142   :  { %798 = vsyncadd [#allocation10], 4294967232 }
 0x143   :  { %483 = vsyncpa [#allocation3], 1 }
 0x144   :  { %484 = vsyncpa [#allocation6], 1 }
 0x145   :  { %485 = vsyncpa [#allocation4], 1 }
 0x146   :  { %486 = vsyncpa [#allocation10], 1 }

</bundles_post_ra>
